<compile_context>
chip_gen: v5e
topology: v5e:2x2
jax: 0.10.0
libtpu: 0.0.40
codegen_flags: <defaults>
</compile_context>

<pallas_src>
import functools

import jax
import jax.numpy as jnp
from jax.experimental import pallas as pl
from jax.experimental.pallas import tpu as pltpu


# ------------------------- Fused LSTM + decode kernel ------------------------
def lstm_fused_kernel(x2d_ref, wih_ref, whh_ref, b_ref, wdec_ref, bdec_ref,
                      out_ref, hlast_sc, *, seq_len, batch, hidden):
    L, N, H = seq_len, batch, hidden

    # (1) Hoisted input projection for ALL timesteps: one (L*N,H)x(H,4H) matmul
    #     plus a single broadcast bias add (bias already = b_ih + b_hh).
    gates_x = (
        jnp.dot(x2d_ref[...], wih_ref[...], preferred_element_type=jnp.float32)
        + b_ref[...]                                   # (1, 4H) broadcast
    )                                                  # (L*N, 4H)

    whh = whh_ref[...]                                 # (H, 4H), kept resident
    h = jnp.zeros((N, H), jnp.float32)
    c = jnp.zeros((N, H), jnp.float32)

    # (2) Serial recurrence; h/c stay in vregs.  L is small -> static unroll.
    for t in range(L):
        gates = gates_x[t * N:(t + 1) * N, :] + jnp.dot(
            h, whh, preferred_element_type=jnp.float32)        # (N, 4H)
        # gate order after wrapper-side permutation: [i | f | o | g]
        s = jax.nn.sigmoid(gates[:, :3 * H])           # one EUP pass for i,f,o
        g = jnp.tanh(gates[:, 3 * H:])                 # one EUP pass for g
        i_g = s[:, :H]
        f_g = s[:, H:2 * H]
        o_g = s[:, 2 * H:3 * H]
        c = f_g * c + i_g * g
        h = o_g * jnp.tanh(c)
        # Only batch row N-1 is ever consumed downstream (output[:, -1, :]).
        hlast_sc[t:t + 1, :] = h[N - 1:N, :]

    # (3) Fused decode: (L,H)x(H,O) + bias, single output write.
    out_ref[...] = (
        jnp.dot(hlast_sc[...], wdec_ref[...], preferred_element_type=jnp.float32)
        + bdec_ref[...]
    )


def lstm_forward(x2d, wih_t, whh_t, b_row, wdec_t, bdec_row, *, seq_len, batch):
    """x2d: (L*N, H) f32; wih_t/whh_t: (H, 4H); b_row: (1, 4H);
    wdec_t: (H, O); bdec_row: (1, O).  Returns (L, O) f32."""
    LN, H = x2d.shape
    O = wdec_t.shape[1]
    kernel = functools.partial(
        lstm_fused_kernel, seq_len=seq_len, batch=batch, hidden=H)
    return pl.pallas_call(
        kernel,
        out_shape=jax.ShapeDtypeStruct((seq_len, O), jnp.float32),
        grid=(1,),
        in_specs=[
            pl.BlockSpec((LN, H), lambda i: (0, 0)),        # embedded x, 2D
            pl.BlockSpec((H, 4 * H), lambda i: (0, 0)),     # W_ih^T (reordered)
            pl.BlockSpec((H, 4 * H), lambda i: (0, 0)),     # W_hh^T (reordered)
            pl.BlockSpec((1, 4 * H), lambda i: (0, 0)),     # b_ih + b_hh (reordered)
            pl.BlockSpec((H, O), lambda i: (0, 0)),         # W_dec^T
            pl.BlockSpec((1, O), lambda i: (0, 0)),         # b_dec
        ],
        out_specs=pl.BlockSpec((seq_len, O), lambda i: (0, 0)),
        scratch_shapes=[pltpu.VMEM((seq_len, H), jnp.float32)],  # h[N-1] rows
        compiler_params=pltpu.CompilerParams(
            dimension_semantics=("arbitrary",)),
    )(x2d, wih_t, whh_t, b_row, wdec_t, bdec_row)


# ----------------------------------- Module ----------------------------------
def _reorder_gates(w, H):
    """PyTorch gate order [i, f, g, o] -> kernel order [i, f, o, g] (axis 0)."""
    return jnp.concatenate([w[:2 * H], w[3 * H:], w[2 * H:3 * H]], axis=0)


class LSTMPallas:
    def __init__(self, input_size, hidden_size, output_size, dropout, n_layers=1,
                 key=jax.random.PRNGKey(0)):
        assert n_layers == 1
        self.input_size = input_size
        self.hidden_size = hidden_size
        self.output_size = output_size
        H = hidden_size
        ks = jax.random.split(key, 7)
        bound = 1.0 / jnp.sqrt(jnp.float32(H))
        u = lambda k, shape: jax.random.uniform(k, shape, jnp.float32, -bound, bound)
        # Parameters (deterministic synthetic init), PyTorch layouts.
        self.embedding = jax.random.normal(ks[0], (input_size, H), jnp.float32)
        self.w_ih = u(ks[1], (4 * H, H))
        self.w_hh = u(ks[2], (4 * H, H))
        self.b_ih = u(ks[3], (4 * H,))
        self.b_hh = u(ks[4], (4 * H,))
        self.w_dec = u(ks[5], (output_size, H))
        self.b_dec = u(ks[6], (output_size,))
        # Kernel-layout parameters: gate columns permuted to [i,f,o,g],
        # transposed so H maps to lanes, biases pre-summed.
        self._wih_t = _reorder_gates(self.w_ih, H).T            # (H, 4H)
        self._whh_t = _reorder_gates(self.w_hh, H).T            # (H, 4H)
        self._b_row = _reorder_gates(self.b_ih + self.b_hh, H)[None, :]  # (1, 4H)
        self._wdec_t = self.w_dec.T                             # (H, O)
        self._bdec_row = self.b_dec[None, :]                    # (1, O)

    def __call__(self, x, hidden=None):
        # x: int32 indices of shape (L, N); hidden is ignored (as in PyTorch fwd).
        L, N = x.shape
        H = self.hidden_size
        # TODO(synk): embedding gather could be fused via scalar prefetch +
        # pl.Element row gather; negligible at these sizes, kept as wrapper glue.
        encoded = jnp.take(self.embedding, x, axis=0)           # (L, N, H)
        x2d = encoded.reshape(L * N, H)                         # layout plumbing
        return lstm_forward(
            x2d, self._wih_t, self._whh_t, self._b_row,
            self._wdec_t, self._bdec_row, seq_len=L, batch=N)   # (L, O)


# ----------------------------- Pure-JAX reference ----------------------------
def reference_forward(model, x):
    H = model.hidden_size
    encoded = jnp.take(model.embedding, x, axis=0)
    L, N, _ = encoded.shape
    h = jnp.zeros((N, H), jnp.float32)
    c = jnp.zeros((N, H), jnp.float32)
    outs = []
    for t in range(L):
        gates = encoded[t] @ model.w_ih.T + model.b_ih + h @ model.w_hh.T + model.b_hh
        i = jax.nn.sigmoid(gates[:, 0 * H:1 * H])
        f = jax.nn.sigmoid(gates[:, 1 * H:2 * H])
        g = jnp.tanh(gates[:, 2 * H:3 * H])
        o = jax.nn.sigmoid(gates[:, 3 * H:4 * H])
        c = f * c + i * g
        h = o * jnp.tanh(c)
        outs.append(h)
    out = jnp.stack(outs)                    # (L, N, H)
    return out[:, -1, :] @ model.w_dec.T + model.b_dec


# ------------------------------------ main -----------------------------------
if __name__ == "__main__":
    input_size, hidden_size, output_size = 16, 32, 8
    L, N = 8, 4                                    # x: seq-like dim0, batch-like dim1

    key = jax.random.PRNGKey(0)
    k_model, k_x = jax.random.split(key)
    model = LSTMPallas(input_size, hidden_size, output_size, dropout=0.5, key=k_model)

    x = jax.random.randint(k_x, (L, N), 0, input_size, dtype=jnp.int32)
    hidden0 = jnp.zeros((1, 1, hidden_size), jnp.float32)   # ignored, as in PyTorch fwd

    out = model(x, hidden0)
    out = jax.block_until_ready(out)

    ref = reference_forward(model, x)
    assert out.shape == (L, output_size)
    assert jnp.allclose(out, ref, rtol=1e-3, atol=1e-3), "mismatch vs reference"

    print("KERNEL_OK")
</pallas_src>

<mosaic_0001>
module attributes {stable_mosaic.version = 11 : i64} {
  func.func @lstm_fused_kernel(%arg0: i32, %arg1: memref<32x32xf32, #tpu.memory_space<vmem>>, %arg2: memref<32x128xf32, #tpu.memory_space<vmem>>, %arg3: memref<32x128xf32, #tpu.memory_space<vmem>>, %arg4: memref<1x128xf32, #tpu.memory_space<vmem>>, %arg5: memref<32x8xf32, #tpu.memory_space<vmem>>, %arg6: memref<1x8xf32, #tpu.memory_space<vmem>>, %arg7: memref<8x8xf32, #tpu.memory_space<vmem>>, %arg8: memref<8x32xf32, #tpu.memory_space<vmem>>) attributes {dimension_semantics = [#tpu.dimension_semantics<arbitrary>], iteration_bounds = array<i64: 1>, scalar_prefetch = 0 : i64, scratch_operands = 1 : i64, tpu.core_type = #tpu.core_type<tc>, window_params = [{pipeline_mode = #tpu.pipeline_mode<synchronous>, transform_indices = @transform_0, window_bounds = array<i64: 32, 32>}, {pipeline_mode = #tpu.pipeline_mode<synchronous>, transform_indices = @transform_1, window_bounds = array<i64: 32, 128>}, {pipeline_mode = #tpu.pipeline_mode<synchronous>, transform_indices = @transform_2, window_bounds = array<i64: 32, 128>}, {pipeline_mode = #tpu.pipeline_mode<synchronous>, transform_indices = @transform_3, window_bounds = array<i64: 1, 128>}, {pipeline_mode = #tpu.pipeline_mode<synchronous>, transform_indices = @transform_4, window_bounds = array<i64: 32, 8>}, {pipeline_mode = #tpu.pipeline_mode<synchronous>, transform_indices = @transform_5, window_bounds = array<i64: 1, 8>}, {pipeline_mode = #tpu.pipeline_mode<synchronous>, transform_indices = @transform_6, window_bounds = array<i64: 8, 8>}]} {
    %c0 = arith.constant 0 : index
    %c0_0 = arith.constant 0 : index
    %0 = vector.load %arg1[%c0, %c0_0] : memref<32x32xf32, #tpu.memory_space<vmem>>, vector<32x32xf32>
    %c0_1 = arith.constant 0 : index
    %c0_2 = arith.constant 0 : index
    %1 = vector.load %arg2[%c0_1, %c0_2] : memref<32x128xf32, #tpu.memory_space<vmem>>, vector<32x128xf32>
    %cst = arith.constant dense<0.000000e+00> : vector<32x128xf32>
    %2 = tpu.matmul %0, %1, %cst {dimension_numbers = #tpu.dot_dimension_numbers<[1], [0], [0], [1], [0, 0, 1, 1], [], []>} : vector<32x32xf32>, vector<32x128xf32>, vector<32x128xf32> -> vector<32x128xf32>
    %c0_3 = arith.constant 0 : index
    %c0_4 = arith.constant 0 : index
    %3 = vector.load %arg4[%c0_3, %c0_4] : memref<1x128xf32, #tpu.memory_space<vmem>>, vector<1x128xf32>
    %4 = vector.broadcast %3 : vector<1x128xf32> to vector<32x128xf32>
    %5 = arith.addf %2, %4 : vector<32x128xf32>
    %c0_5 = arith.constant 0 : index
    %c0_6 = arith.constant 0 : index
    %6 = vector.load %arg3[%c0_5, %c0_6] : memref<32x128xf32, #tpu.memory_space<vmem>>, vector<32x128xf32>
    %cst_7 = arith.constant 0.000000e+00 : f32
    %7 = vector.broadcast %cst_7 : f32 to vector<4x32xf32>
    %cst_8 = arith.constant 0.000000e+00 : f32
    %8 = vector.broadcast %cst_8 : f32 to vector<4x32xf32>
    %9 = vector.extract_strided_slice %5 {offsets = [0, 0], sizes = [4, 128], strides = [1, 1]} : vector<32x128xf32> to vector<4x128xf32>
    %cst_9 = arith.constant dense<0.000000e+00> : vector<4x128xf32>
    %10 = tpu.matmul %7, %6, %cst_9 {dimension_numbers = #tpu.dot_dimension_numbers<[1], [0], [0], [1], [0, 0, 1, 1], [], []>} : vector<4x32xf32>, vector<32x128xf32>, vector<4x128xf32> -> vector<4x128xf32>
    %11 = arith.addf %9, %10 : vector<4x128xf32>
    %12 = vector.extract_strided_slice %11 {offsets = [0, 0], sizes = [4, 96], strides = [1, 1]} : vector<4x128xf32> to vector<4x96xf32>
    %13 = arith.negf %12 : vector<4x96xf32>
    %14 = math.exp %13 : vector<4x96xf32>
    %cst_10 = arith.constant 1.000000e+00 : f32
    %15 = vector.broadcast %cst_10 : f32 to vector<4x96xf32>
    %16 = arith.addf %15, %14 : vector<4x96xf32>
    %17 = arith.divf %15, %16 : vector<4x96xf32>
    %18 = vector.extract_strided_slice %11 {offsets = [0, 96], sizes = [4, 32], strides = [1, 1]} : vector<4x128xf32> to vector<4x32xf32>
    %19 = math.tanh %18 : vector<4x32xf32>
    %20 = vector.extract_strided_slice %17 {offsets = [0, 0], sizes = [4, 32], strides = [1, 1]} : vector<4x96xf32> to vector<4x32xf32>
    %21 = vector.extract_strided_slice %17 {offsets = [0, 32], sizes = [4, 32], strides = [1, 1]} : vector<4x96xf32> to vector<4x32xf32>
    %22 = vector.extract_strided_slice %17 {offsets = [0, 64], sizes = [4, 32], strides = [1, 1]} : vector<4x96xf32> to vector<4x32xf32>
    %23 = arith.mulf %21, %8 : vector<4x32xf32>
    %24 = arith.mulf %20, %19 : vector<4x32xf32>
    %25 = arith.addf %23, %24 : vector<4x32xf32>
    %26 = math.tanh %25 : vector<4x32xf32>
    %27 = arith.mulf %22, %26 : vector<4x32xf32>
    %28 = vector.extract_strided_slice %27 {offsets = [3, 0], sizes = [1, 32], strides = [1, 1]} : vector<4x32xf32> to vector<1x32xf32>
    %c0_11 = arith.constant 0 : index
    %c0_12 = arith.constant 0 : index
    %29 = vector.load %arg8[%c0_11, %c0_12] : memref<8x32xf32, #tpu.memory_space<vmem>>, vector<1x32xf32>
    tpu.vector_store %arg8[%c0_11, %c0_12], %28 {strides = array<i32>} : memref<8x32xf32, #tpu.memory_space<vmem>>, vector<1x32xf32>,
    %30 = vector.extract_strided_slice %5 {offsets = [4, 0], sizes = [4, 128], strides = [1, 1]} : vector<32x128xf32> to vector<4x128xf32>
    %cst_13 = arith.constant dense<0.000000e+00> : vector<4x128xf32>
    %31 = tpu.matmul %27, %6, %cst_13 {dimension_numbers = #tpu.dot_dimension_numbers<[1], [0], [0], [1], [0, 0, 1, 1], [], []>} : vector<4x32xf32>, vector<32x128xf32>, vector<4x128xf32> -> vector<4x128xf32>
    %32 = arith.addf %30, %31 : vector<4x128xf32>
    %33 = vector.extract_strided_slice %32 {offsets = [0, 0], sizes = [4, 96], strides = [1, 1]} : vector<4x128xf32> to vector<4x96xf32>
    %34 = arith.negf %33 : vector<4x96xf32>
    %35 = math.exp %34 : vector<4x96xf32>
    %cst_14 = arith.constant 1.000000e+00 : f32
    %36 = vector.broadcast %cst_14 : f32 to vector<4x96xf32>
    %37 = arith.addf %36, %35 : vector<4x96xf32>
    %38 = arith.divf %36, %37 : vector<4x96xf32>
    %39 = vector.extract_strided_slice %32 {offsets = [0, 96], sizes = [4, 32], strides = [1, 1]} : vector<4x128xf32> to vector<4x32xf32>
    %40 = math.tanh %39 : vector<4x32xf32>
    %41 = vector.extract_strided_slice %38 {offsets = [0, 0], sizes = [4, 32], strides = [1, 1]} : vector<4x96xf32> to vector<4x32xf32>
    %42 = vector.extract_strided_slice %38 {offsets = [0, 32], sizes = [4, 32], strides = [1, 1]} : vector<4x96xf32> to vector<4x32xf32>
    %43 = vector.extract_strided_slice %38 {offsets = [0, 64], sizes = [4, 32], strides = [1, 1]} : vector<4x96xf32> to vector<4x32xf32>
    %44 = arith.mulf %42, %25 : vector<4x32xf32>
    %45 = arith.mulf %41, %40 : vector<4x32xf32>
    %46 = arith.addf %44, %45 : vector<4x32xf32>
    %47 = math.tanh %46 : vector<4x32xf32>
    %48 = arith.mulf %43, %47 : vector<4x32xf32>
    %49 = vector.extract_strided_slice %48 {offsets = [3, 0], sizes = [1, 32], strides = [1, 1]} : vector<4x32xf32> to vector<1x32xf32>
    %c1 = arith.constant 1 : index
    %c0_15 = arith.constant 0 : index
    %50 = vector.load %arg8[%c1, %c0_15] : memref<8x32xf32, #tpu.memory_space<vmem>>, vector<1x32xf32>
    tpu.vector_store %arg8[%c1, %c0_15], %49 {strides = array<i32>} : memref<8x32xf32, #tpu.memory_space<vmem>>, vector<1x32xf32>,
    %51 = vector.extract_strided_slice %5 {offsets = [8, 0], sizes = [4, 128], strides = [1, 1]} : vector<32x128xf32> to vector<4x128xf32>
    %cst_16 = arith.constant dense<0.000000e+00> : vector<4x128xf32>
    %52 = tpu.matmul %48, %6, %cst_16 {dimension_numbers = #tpu.dot_dimension_numbers<[1], [0], [0], [1], [0, 0, 1, 1], [], []>} : vector<4x32xf32>, vector<32x128xf32>, vector<4x128xf32> -> vector<4x128xf32>
    %53 = arith.addf %51, %52 : vector<4x128xf32>
    %54 = vector.extract_strided_slice %53 {offsets = [0, 0], sizes = [4, 96], strides = [1, 1]} : vector<4x128xf32> to vector<4x96xf32>
    %55 = arith.negf %54 : vector<4x96xf32>
    %56 = math.exp %55 : vector<4x96xf32>
    %cst_17 = arith.constant 1.000000e+00 : f32
    %57 = vector.broadcast %cst_17 : f32 to vector<4x96xf32>
    %58 = arith.addf %57, %56 : vector<4x96xf32>
    %59 = arith.divf %57, %58 : vector<4x96xf32>
    %60 = vector.extract_strided_slice %53 {offsets = [0, 96], sizes = [4, 32], strides = [1, 1]} : vector<4x128xf32> to vector<4x32xf32>
    %61 = math.tanh %60 : vector<4x32xf32>
    %62 = vector.extract_strided_slice %59 {offsets = [0, 0], sizes = [4, 32], strides = [1, 1]} : vector<4x96xf32> to vector<4x32xf32>
    %63 = vector.extract_strided_slice %59 {offsets = [0, 32], sizes = [4, 32], strides = [1, 1]} : vector<4x96xf32> to vector<4x32xf32>
    %64 = vector.extract_strided_slice %59 {offsets = [0, 64], sizes = [4, 32], strides = [1, 1]} : vector<4x96xf32> to vector<4x32xf32>
    %65 = arith.mulf %63, %46 : vector<4x32xf32>
    %66 = arith.mulf %62, %61 : vector<4x32xf32>
    %67 = arith.addf %65, %66 : vector<4x32xf32>
    %68 = math.tanh %67 : vector<4x32xf32>
    %69 = arith.mulf %64, %68 : vector<4x32xf32>
    %70 = vector.extract_strided_slice %69 {offsets = [3, 0], sizes = [1, 32], strides = [1, 1]} : vector<4x32xf32> to vector<1x32xf32>
    %c2 = arith.constant 2 : index
    %c0_18 = arith.constant 0 : index
    %71 = vector.load %arg8[%c2, %c0_18] : memref<8x32xf32, #tpu.memory_space<vmem>>, vector<1x32xf32>
    tpu.vector_store %arg8[%c2, %c0_18], %70 {strides = array<i32>} : memref<8x32xf32, #tpu.memory_space<vmem>>, vector<1x32xf32>,
    %72 = vector.extract_strided_slice %5 {offsets = [12, 0], sizes = [4, 128], strides = [1, 1]} : vector<32x128xf32> to vector<4x128xf32>
    %cst_19 = arith.constant dense<0.000000e+00> : vector<4x128xf32>
    %73 = tpu.matmul %69, %6, %cst_19 {dimension_numbers = #tpu.dot_dimension_numbers<[1], [0], [0], [1], [0, 0, 1, 1], [], []>} : vector<4x32xf32>, vector<32x128xf32>, vector<4x128xf32> -> vector<4x128xf32>
    %74 = arith.addf %72, %73 : vector<4x128xf32>
    %75 = vector.extract_strided_slice %74 {offsets = [0, 0], sizes = [4, 96], strides = [1, 1]} : vector<4x128xf32> to vector<4x96xf32>
    %76 = arith.negf %75 : vector<4x96xf32>
    %77 = math.exp %76 : vector<4x96xf32>
    %cst_20 = arith.constant 1.000000e+00 : f32
    %78 = vector.broadcast %cst_20 : f32 to vector<4x96xf32>
    %79 = arith.addf %78, %77 : vector<4x96xf32>
    %80 = arith.divf %78, %79 : vector<4x96xf32>
    %81 = vector.extract_strided_slice %74 {offsets = [0, 96], sizes = [4, 32], strides = [1, 1]} : vector<4x128xf32> to vector<4x32xf32>
    %82 = math.tanh %81 : vector<4x32xf32>
    %83 = vector.extract_strided_slice %80 {offsets = [0, 0], sizes = [4, 32], strides = [1, 1]} : vector<4x96xf32> to vector<4x32xf32>
    %84 = vector.extract_strided_slice %80 {offsets = [0, 32], sizes = [4, 32], strides = [1, 1]} : vector<4x96xf32> to vector<4x32xf32>
    %85 = vector.extract_strided_slice %80 {offsets = [0, 64], sizes = [4, 32], strides = [1, 1]} : vector<4x96xf32> to vector<4x32xf32>
    %86 = arith.mulf %84, %67 : vector<4x32xf32>
    %87 = arith.mulf %83, %82 : vector<4x32xf32>
    %88 = arith.addf %86, %87 : vector<4x32xf32>
    %89 = math.tanh %88 : vector<4x32xf32>
    %90 = arith.mulf %85, %89 : vector<4x32xf32>
    %91 = vector.extract_strided_slice %90 {offsets = [3, 0], sizes = [1, 32], strides = [1, 1]} : vector<4x32xf32> to vector<1x32xf32>
    %c3 = arith.constant 3 : index
    %c0_21 = arith.constant 0 : index
    %92 = vector.load %arg8[%c3, %c0_21] : memref<8x32xf32, #tpu.memory_space<vmem>>, vector<1x32xf32>
    tpu.vector_store %arg8[%c3, %c0_21], %91 {strides = array<i32>} : memref<8x32xf32, #tpu.memory_space<vmem>>, vector<1x32xf32>,
    %93 = vector.extract_strided_slice %5 {offsets = [16, 0], sizes = [4, 128], strides = [1, 1]} : vector<32x128xf32> to vector<4x128xf32>
    %cst_22 = arith.constant dense<0.000000e+00> : vector<4x128xf32>
    %94 = tpu.matmul %90, %6, %cst_22 {dimension_numbers = #tpu.dot_dimension_numbers<[1], [0], [0], [1], [0, 0, 1, 1], [], []>} : vector<4x32xf32>, vector<32x128xf32>, vector<4x128xf32> -> vector<4x128xf32>
    %95 = arith.addf %93, %94 : vector<4x128xf32>
    %96 = vector.extract_strided_slice %95 {offsets = [0, 0], sizes = [4, 96], strides = [1, 1]} : vector<4x128xf32> to vector<4x96xf32>
    %97 = arith.negf %96 : vector<4x96xf32>
    %98 = math.exp %97 : vector<4x96xf32>
    %cst_23 = arith.constant 1.000000e+00 : f32
    %99 = vector.broadcast %cst_23 : f32 to vector<4x96xf32>
    %100 = arith.addf %99, %98 : vector<4x96xf32>
    %101 = arith.divf %99, %100 : vector<4x96xf32>
    %102 = vector.extract_strided_slice %95 {offsets = [0, 96], sizes = [4, 32], strides = [1, 1]} : vector<4x128xf32> to vector<4x32xf32>
    %103 = math.tanh %102 : vector<4x32xf32>
    %104 = vector.extract_strided_slice %101 {offsets = [0, 0], sizes = [4, 32], strides = [1, 1]} : vector<4x96xf32> to vector<4x32xf32>
    %105 = vector.extract_strided_slice %101 {offsets = [0, 32], sizes = [4, 32], strides = [1, 1]} : vector<4x96xf32> to vector<4x32xf32>
    %106 = vector.extract_strided_slice %101 {offsets = [0, 64], sizes = [4, 32], strides = [1, 1]} : vector<4x96xf32> to vector<4x32xf32>
    %107 = arith.mulf %105, %88 : vector<4x32xf32>
    %108 = arith.mulf %104, %103 : vector<4x32xf32>
    %109 = arith.addf %107, %108 : vector<4x32xf32>
    %110 = math.tanh %109 : vector<4x32xf32>
    %111 = arith.mulf %106, %110 : vector<4x32xf32>
    %112 = vector.extract_strided_slice %111 {offsets = [3, 0], sizes = [1, 32], strides = [1, 1]} : vector<4x32xf32> to vector<1x32xf32>
    %c4 = arith.constant 4 : index
    %c0_24 = arith.constant 0 : index
    %113 = vector.load %arg8[%c4, %c0_24] : memref<8x32xf32, #tpu.memory_space<vmem>>, vector<1x32xf32>
    tpu.vector_store %arg8[%c4, %c0_24], %112 {strides = array<i32>} : memref<8x32xf32, #tpu.memory_space<vmem>>, vector<1x32xf32>,
    %114 = vector.extract_strided_slice %5 {offsets = [20, 0], sizes = [4, 128], strides = [1, 1]} : vector<32x128xf32> to vector<4x128xf32>
    %cst_25 = arith.constant dense<0.000000e+00> : vector<4x128xf32>
    %115 = tpu.matmul %111, %6, %cst_25 {dimension_numbers = #tpu.dot_dimension_numbers<[1], [0], [0], [1], [0, 0, 1, 1], [], []>} : vector<4x32xf32>, vector<32x128xf32>, vector<4x128xf32> -> vector<4x128xf32>
    %116 = arith.addf %114, %115 : vector<4x128xf32>
    %117 = vector.extract_strided_slice %116 {offsets = [0, 0], sizes = [4, 96], strides = [1, 1]} : vector<4x128xf32> to vector<4x96xf32>
    %118 = arith.negf %117 : vector<4x96xf32>
    %119 = math.exp %118 : vector<4x96xf32>
    %cst_26 = arith.constant 1.000000e+00 : f32
    %120 = vector.broadcast %cst_26 : f32 to vector<4x96xf32>
    %121 = arith.addf %120, %119 : vector<4x96xf32>
    %122 = arith.divf %120, %121 : vector<4x96xf32>
    %123 = vector.extract_strided_slice %116 {offsets = [0, 96], sizes = [4, 32], strides = [1, 1]} : vector<4x128xf32> to vector<4x32xf32>
    %124 = math.tanh %123 : vector<4x32xf32>
    %125 = vector.extract_strided_slice %122 {offsets = [0, 0], sizes = [4, 32], strides = [1, 1]} : vector<4x96xf32> to vector<4x32xf32>
    %126 = vector.extract_strided_slice %122 {offsets = [0, 32], sizes = [4, 32], strides = [1, 1]} : vector<4x96xf32> to vector<4x32xf32>
    %127 = vector.extract_strided_slice %122 {offsets = [0, 64], sizes = [4, 32], strides = [1, 1]} : vector<4x96xf32> to vector<4x32xf32>
    %128 = arith.mulf %126, %109 : vector<4x32xf32>
    %129 = arith.mulf %125, %124 : vector<4x32xf32>
    %130 = arith.addf %128, %129 : vector<4x32xf32>
    %131 = math.tanh %130 : vector<4x32xf32>
    %132 = arith.mulf %127, %131 : vector<4x32xf32>
    %133 = vector.extract_strided_slice %132 {offsets = [3, 0], sizes = [1, 32], strides = [1, 1]} : vector<4x32xf32> to vector<1x32xf32>
    %c5 = arith.constant 5 : index
    %c0_27 = arith.constant 0 : index
    %134 = vector.load %arg8[%c5, %c0_27] : memref<8x32xf32, #tpu.memory_space<vmem>>, vector<1x32xf32>
    tpu.vector_store %arg8[%c5, %c0_27], %133 {strides = array<i32>} : memref<8x32xf32, #tpu.memory_space<vmem>>, vector<1x32xf32>,
    %135 = vector.extract_strided_slice %5 {offsets = [24, 0], sizes = [4, 128], strides = [1, 1]} : vector<32x128xf32> to vector<4x128xf32>
    %cst_28 = arith.constant dense<0.000000e+00> : vector<4x128xf32>
    %136 = tpu.matmul %132, %6, %cst_28 {dimension_numbers = #tpu.dot_dimension_numbers<[1], [0], [0], [1], [0, 0, 1, 1], [], []>} : vector<4x32xf32>, vector<32x128xf32>, vector<4x128xf32> -> vector<4x128xf32>
    %137 = arith.addf %135, %136 : vector<4x128xf32>
    %138 = vector.extract_strided_slice %137 {offsets = [0, 0], sizes = [4, 96], strides = [1, 1]} : vector<4x128xf32> to vector<4x96xf32>
    %139 = arith.negf %138 : vector<4x96xf32>
    %140 = math.exp %139 : vector<4x96xf32>
    %cst_29 = arith.constant 1.000000e+00 : f32
    %141 = vector.broadcast %cst_29 : f32 to vector<4x96xf32>
    %142 = arith.addf %141, %140 : vector<4x96xf32>
    %143 = arith.divf %141, %142 : vector<4x96xf32>
    %144 = vector.extract_strided_slice %137 {offsets = [0, 96], sizes = [4, 32], strides = [1, 1]} : vector<4x128xf32> to vector<4x32xf32>
    %145 = math.tanh %144 : vector<4x32xf32>
    %146 = vector.extract_strided_slice %143 {offsets = [0, 0], sizes = [4, 32], strides = [1, 1]} : vector<4x96xf32> to vector<4x32xf32>
    %147 = vector.extract_strided_slice %143 {offsets = [0, 32], sizes = [4, 32], strides = [1, 1]} : vector<4x96xf32> to vector<4x32xf32>
    %148 = vector.extract_strided_slice %143 {offsets = [0, 64], sizes = [4, 32], strides = [1, 1]} : vector<4x96xf32> to vector<4x32xf32>
    %149 = arith.mulf %147, %130 : vector<4x32xf32>
    %150 = arith.mulf %146, %145 : vector<4x32xf32>
    %151 = arith.addf %149, %150 : vector<4x32xf32>
    %152 = math.tanh %151 : vector<4x32xf32>
    %153 = arith.mulf %148, %152 : vector<4x32xf32>
    %154 = vector.extract_strided_slice %153 {offsets = [3, 0], sizes = [1, 32], strides = [1, 1]} : vector<4x32xf32> to vector<1x32xf32>
    %c6 = arith.constant 6 : index
    %c0_30 = arith.constant 0 : index
    %155 = vector.load %arg8[%c6, %c0_30] : memref<8x32xf32, #tpu.memory_space<vmem>>, vector<1x32xf32>
    tpu.vector_store %arg8[%c6, %c0_30], %154 {strides = array<i32>} : memref<8x32xf32, #tpu.memory_space<vmem>>, vector<1x32xf32>,
    %156 = vector.extract_strided_slice %5 {offsets = [28, 0], sizes = [4, 128], strides = [1, 1]} : vector<32x128xf32> to vector<4x128xf32>
    %cst_31 = arith.constant dense<0.000000e+00> : vector<4x128xf32>
    %157 = tpu.matmul %153, %6, %cst_31 {dimension_numbers = #tpu.dot_dimension_numbers<[1], [0], [0], [1], [0, 0, 1, 1], [], []>} : vector<4x32xf32>, vector<32x128xf32>, vector<4x128xf32> -> vector<4x128xf32>
    %158 = arith.addf %156, %157 : vector<4x128xf32>
    %159 = vector.extract_strided_slice %158 {offsets = [0, 0], sizes = [4, 96], strides = [1, 1]} : vector<4x128xf32> to vector<4x96xf32>
    %160 = arith.negf %159 : vector<4x96xf32>
    %161 = math.exp %160 : vector<4x96xf32>
    %cst_32 = arith.constant 1.000000e+00 : f32
    %162 = vector.broadcast %cst_32 : f32 to vector<4x96xf32>
    %163 = arith.addf %162, %161 : vector<4x96xf32>
    %164 = arith.divf %162, %163 : vector<4x96xf32>
    %165 = vector.extract_strided_slice %158 {offsets = [0, 96], sizes = [4, 32], strides = [1, 1]} : vector<4x128xf32> to vector<4x32xf32>
    %166 = math.tanh %165 : vector<4x32xf32>
    %167 = vector.extract_strided_slice %164 {offsets = [0, 0], sizes = [4, 32], strides = [1, 1]} : vector<4x96xf32> to vector<4x32xf32>
    %168 = vector.extract_strided_slice %164 {offsets = [0, 32], sizes = [4, 32], strides = [1, 1]} : vector<4x96xf32> to vector<4x32xf32>
    %169 = vector.extract_strided_slice %164 {offsets = [0, 64], sizes = [4, 32], strides = [1, 1]} : vector<4x96xf32> to vector<4x32xf32>
    %170 = arith.mulf %168, %151 : vector<4x32xf32>
    %171 = arith.mulf %167, %166 : vector<4x32xf32>
    %172 = arith.addf %170, %171 : vector<4x32xf32>
    %173 = math.tanh %172 : vector<4x32xf32>
    %174 = arith.mulf %169, %173 : vector<4x32xf32>
    %175 = vector.extract_strided_slice %174 {offsets = [3, 0], sizes = [1, 32], strides = [1, 1]} : vector<4x32xf32> to vector<1x32xf32>
    %c7 = arith.constant 7 : index
    %c0_33 = arith.constant 0 : index
    %176 = vector.load %arg8[%c7, %c0_33] : memref<8x32xf32, #tpu.memory_space<vmem>>, vector<1x32xf32>
    tpu.vector_store %arg8[%c7, %c0_33], %175 {strides = array<i32>} : memref<8x32xf32, #tpu.memory_space<vmem>>, vector<1x32xf32>,
    %c0_34 = arith.constant 0 : index
    %c0_35 = arith.constant 0 : index
    %177 = vector.load %arg8[%c0_34, %c0_35] : memref<8x32xf32, #tpu.memory_space<vmem>>, vector<8x32xf32>
    %c0_36 = arith.constant 0 : index
    %c0_37 = arith.constant 0 : index
    %178 = vector.load %arg5[%c0_36, %c0_37] : memref<32x8xf32, #tpu.memory_space<vmem>>, vector<32x8xf32>
    %cst_38 = arith.constant dense<0.000000e+00> : vector<8x8xf32>
    %179 = tpu.matmul %177, %178, %cst_38 {dimension_numbers = #tpu.dot_dimension_numbers<[1], [0], [0], [1], [0, 0, 1, 1], [], []>} : vector<8x32xf32>, vector<32x8xf32>, vector<8x8xf32> -> vector<8x8xf32>
    %c0_39 = arith.constant 0 : index
    %c0_40 = arith.constant 0 : index
    %180 = vector.load %arg6[%c0_39, %c0_40] : memref<1x8xf32, #tpu.memory_space<vmem>>, vector<1x8xf32>
    %181 = vector.broadcast %180 : vector<1x8xf32> to vector<8x8xf32>
    %182 = arith.addf %179, %181 : vector<8x8xf32>
    %c0_41 = arith.constant 0 : index
    %c0_42 = arith.constant 0 : index
    %183 = vector.load %arg7[%c0_41, %c0_42] : memref<8x8xf32, #tpu.memory_space<vmem>>, vector<8x8xf32>
    tpu.vector_store %arg7[%c0_41, %c0_42], %182 {strides = array<i32>} : memref<8x8xf32, #tpu.memory_space<vmem>>, vector<8x8xf32>,
    return
  }
  func.func @transform_0(%arg0: i32) -> (i32, i32) {
    %c0_i32 = arith.constant 0 : i32
    %c0_i32_0 = arith.constant 0 : i32
    %c0_i32_1 = arith.constant 0 : i32
    return %c0_i32, %c0_i32_0 : i32, i32
  }
  func.func @transform_1(%arg0: i32) -> (i32, i32) {
    %c0_i32 = arith.constant 0 : i32
    %c0_i32_0 = arith.constant 0 : i32
    %c0_i32_1 = arith.constant 0 : i32
    return %c0_i32, %c0_i32_0 : i32, i32
  }
  func.func @transform_2(%arg0: i32) -> (i32, i32) {
    %c0_i32 = arith.constant 0 : i32
    %c0_i32_0 = arith.constant 0 : i32
    %c0_i32_1 = arith.constant 0 : i32
    return %c0_i32, %c0_i32_0 : i32, i32
  }
  func.func @transform_3(%arg0: i32) -> (i32, i32) {
    %c0_i32 = arith.constant 0 : i32
    %c0_i32_0 = arith.constant 0 : i32
    %c0_i32_1 = arith.constant 0 : i32
    return %c0_i32, %c0_i32_0 : i32, i32
  }
  func.func @transform_4(%arg0: i32) -> (i32, i32) {
    %c0_i32 = arith.constant 0 : i32
    %c0_i32_0 = arith.constant 0 : i32
    %c0_i32_1 = arith.constant 0 : i32
    return %c0_i32, %c0_i32_0 : i32, i32
  }
  func.func @transform_5(%arg0: i32) -> (i32, i32) {
    %c0_i32 = arith.constant 0 : i32
    %c0_i32_0 = arith.constant 0 : i32
    %c0_i32_1 = arith.constant 0 : i32
    return %c0_i32, %c0_i32_0 : i32, i32
  }
  func.func @transform_6(%arg0: i32) -> (i32, i32) {
    %c0_i32 = arith.constant 0 : i32
    %c0_i32_0 = arith.constant 0 : i32
    %c0_i32_1 = arith.constant 0 : i32
    return %c0_i32, %c0_i32_0 : i32, i32
  }
}

</mosaic_0001>

<bundles_post_ra>
// kernel: tpu_custom_call.1
= control target key start
LH: loop header
LB: loop body
LE: loop exit
PB: predicated region body
PF: predicated region fallthrough
CT: control target
= control target key end

     0   :  { %11 = vsyncpa [#allocation4], 0  ;;  %s1098_s0 = inlined_call_operand.vmem [shape: f32[32,32], index: 0, kind: input, shape index: {}]   ;;  %s1099_s1 = inlined_call_operand.hbm [shape: f32[32,128], index: 1, kind: input, shape index: {}]   ;;  %s1100_s2 = inlined_call_operand.hbm [shape: f32[32,128], index: 2, kind: input, shape index: {}]   ;;  %s1101_s3 = inlined_call_operand.vmem [shape: f32[1,128], index: 3, kind: input, shape index: {}]   ;;  %s1102_s4 = inlined_call_operand.vmem [shape: f32[32,8], index: 4, kind: input, shape index: {}]   ;;  %s1103_s5 = inlined_call_operand.vmem [shape: f32[1,8], index: 5, kind: input, shape index: {}]   ;;  %s1104_s6 = inlined_call_operand.hbm [shape: f32[8,8], index: 6, kind: output, shape index: {}]  }
   0x1   :  { %12 = vsyncpa [#allocation7], 0 }
   0x2   :  { %13 = vsyncpa [#allocation5], 0  ;;  %s20_s23 = sshll.u32 %s1099_s1, 4  ;;  %s903_s24 = smov [#allocation3]   ;;  %s21_s23 = int_to_ptr.hbm [resolvable:$true] %s20_s23 }
   0x3   :  { %s22_s25 = sshll.u32 %s903_s24, 4  ;;  %s33_s28 = sshll.u32 %s1100_s2, 4  ;;  %s23_s25 = int_to_ptr.vmem [resolvable:$true] %s22_s25  ;;  %s34_s28 = int_to_ptr.hbm [resolvable:$true] %s33_s28 }
   0x4   :  { %s904_s29 = smov 128   ;;  %s905_s30 = smov 8  }
   0x5   :  { %28 = dma.hbm_to_vmem [thread:$0]  %s21_s23, 512, %s23_s25, [#allocation4], %s904_s29, %s904_s29, %s905_s30  }
   0x6   :  { %s906_s7 = smov [#allocation6]  }
   0x7   :  { %s35_s8 = sshll.u32 %s906_s7, 4  ;;  %s36_s8 = int_to_ptr.vmem [resolvable:$true] %s35_s8 }
   0x8   :  { %41 = dma.hbm_to_vmem [thread:$0]  %s34_s28, 512, %s36_s8, [#allocation7], %s904_s29, %s904_s29, %s905_s30  }
   0x9   :  { %897 = dma.done.wait [#allocation4], 512  }
   0xa   :  { %898 = vsyncadd [#allocation4], 4294966784 }
   0xb   :  { %899 = dma.done.wait [#allocation7], 512  }
   0xc   :  { %900 = vsyncadd [#allocation7], 4294966784  ;;  %v63_v0 = vld [vmem:[#allocation3 + $0x18] sm:$0xff]  ;;  %v62_v1 = vld [vmem:[#allocation3 + $0x10] sm:$0xff]  ;;  %vm68_vm0 = vcmask 261120   ;;  %v907_v9 = vmov 0.0  }
   0xd   :  { %v952_v2 = vld [vmem:[#allocation6 + $0x18] sm:$0xff]  ;;  %93 = vmatpush.msra.mxu0 %v63_v0  ;;  %v955_v3 = vld [vmem:[#allocation6 + $0x10] sm:$0xff]  ;;  %v61_v4 = vld [vmem:[#allocation3 + $0x8] sm:$0xff]  ;;  %s908_s11 = smov 32   ;;  %vm179_vm5 = vcmask 257027   ;;  %s910_s27 = smov [#allocation8]  }
   0xe   :  { %129 = vmatpush.msra.mxu1 %v952_v2  ;;  %v957_v5 = vld [vmem:[#allocation6 + $0x8] sm:$0xff]  ;;  %195 = vmatpush.msra.mxu2 %v952_v2  ;;  %v60_v6 = vld [vmem:[#allocation3] sm:$0xff]  ;;  %v56_v8 = vld [vmem:[%s1098_s0] sm:$0xff]  ;;  %s718_s28 = sshll.u32 %s910_s27, 4  ;;  %s720_s7 = sshll.u32 %s1104_s6, 4  ;;  %s719_s28 = int_to_ptr.vmem [resolvable:$true] %s718_s28  ;;  %s721_s7 = int_to_ptr.hbm [resolvable:$true] %s720_s7 }
   0xf   :  { %270 = vmatpush.msra.mxu3 %v952_v2  ;;  %94 = vmatpush.msra.mxu0 %v62_v1  ;;  %v962_v7 = vld [vmem:[#allocation6] sm:$0xff]  ;;  %v995_v10 = vld [vmem:[%s1101_s3] ss:$0 sm:$0xff]  ;;  %s909_s3 = smov 64  }
  0x10   :  { %130 = vmatpush.msra.mxu1 %v955_v3  ;;  %196 = vmatpush.msra.mxu2 %v955_v3  ;;  %v57_v1 = vld [vmem:[%s1098_s0 + $0x8] sm:$0xff] }
  0x11   :  { %271 = vmatpush.msra.mxu3 %v955_v3  ;;  %95 = vmatpush.msra.mxu0 %v61_v4 }
  0x12   :  { %131 = vmatpush.msra.mxu1 %v957_v5  ;;  %197 = vmatpush.msra.mxu2 %v957_v5 }
  0x13   :  { %272 = vmatpush.msra.mxu3 %v957_v5  ;;  %96 = vmatpush.msra.mxu0 %v60_v6 }
  0x14   :  { %132 = vmatpush.msra.mxu1 %v962_v7  ;;  %731 = vmatmul.msk.f32.vlgmr.msra.gmra.mxu0 %vm68_vm0, %v56_v8 }
  0x15   :  { %133 = vmatmul.f32.vlgmr.msra.gmra.mxu1 %v907_v9  ;;  %198 = vmatpush.msra.mxu2 %v962_v7 }
  0x16   :  { %273 = vmatpush.msra.mxu3 %v962_v7  ;;  %338 = vmatpush.msrb.mxu1 %v952_v2 }
  0x17   :  { %412 = vmatpush.msrb.mxu2 %v952_v2 }
  0x18   :  { %480 = vmatpush.msrb.mxu3 %v952_v2  ;;  %339 = vmatpush.msrb.mxu1 %v955_v3 }
  0x19   :  { %413 = vmatpush.msrb.mxu2 %v955_v3 }
  0x1a   :  { %481 = vmatpush.msrb.mxu3 %v955_v3  ;;  %340 = vmatpush.msrb.mxu1 %v957_v5 }
  0x1b   :  { %414 = vmatpush.msrb.mxu2 %v957_v5 }
  0x1c   :  { %482 = vmatpush.msrb.mxu3 %v957_v5  ;;  %341 = vmatpush.msrb.mxu1 %v962_v7 }
  0x1d   :  { %415 = vmatpush.msrb.mxu2 %v962_v7  ;;  %732 = vmatmul.msk.f32.gmra.mxu0 %vm68_vm0, %v57_v1 }
  0x1e   :  { %483 = vmatpush.msrb.mxu3 %v962_v7  ;;  %554 = vmatpush.msra.mxu1 %v952_v2 }
  0x20   :  { %555 = vmatpush.msra.mxu1 %v955_v3 }
  0x22   :  { %556 = vmatpush.msra.mxu1 %v957_v5 }
  0x24   :  { %557 = vmatpush.msra.mxu1 %v962_v7 }
  0x91   :  { %v98_v11 = vpop.f32.mrf.mxu0 }
  0x92   :  { %v134_v12 = vpop.f32.mrf.mxu1  ;;  %v99_v13 = vadd.f32 %v995_v10, %v98_v11 }
  0x94   :  { %v137_v14 = vadd.f32 %v134_v12, %v99_v13 }
  0x96   :  { %761 = vtanh.f32 %v137_v14  ;;  %v735_v16 = vmul.f32 -1.442695, %v137_v14 }
  0x98   :  { %763 = vpow2.f32 %v735_v16 }
  0x9c   :  { %v762_v15 = vpop.eup %761 }
  0x9d   :  { %160 = vrot.lane.b32.xlu0 %v762_v15, %s908_s11 }
  0x9e   :  { %v764_v17 = vpop.eup %763 }
  0x9f   :  { %v141_v18 = vadd.f32 1.0, %v764_v17 }
  0xa1   :  { %765 = vrcp.f32 %v141_v18  ;;  %v153_v24 = vand.u32 2147483648, %v141_v18  ;;  %vm147_vm2 = vweird.f32 %v141_v18  ;;  %v151_v25 = vand.u32 2147483647, %v141_v18 }
  0xa3   :  { %v154_v27 = vor.u32 1.1754944e-38, %v153_v24  ;;  %vm152_vm4 = vcmp.eq.f32.partialorder %v151_v25, 8.507059e+37 }
  0xa7   :  { %v766_v19 = vpop.eup %765 }
  0xa8   :  { %v143_v20 = vmul.f32 %v766_v19, %v141_v18  ;;  %vm148_vm1 = vweird.f32 %v766_v19 }
  0xa9   :  { %vm149_vm3 = vmor %vm147_vm2, %vm148_vm1 }
  0xaa   :  { %v144_v21 = vsub.f32 1.0, %v143_v20 }
  0xac   :  { %v145_v22 = vmul.f32 %v766_v19, %v144_v21 }
  0xae   :  { %v146_v23 = vadd.f32 %v766_v19, %v145_v22 }
  0xb0   :  { %v150_v26 = vsel %vm149_vm3, %v766_v19, %v146_v23 }
  0xb1   :  { %v155_v29 = vsel %vm152_vm4, %v154_v27, %v150_v26 }
  0xb2   :  { %v158_v31 = vmul.f32 0.0, %v155_v29 }
 0x10f   :  { %v161_v28 = vpop.permute.xlu0 %160 }
 0x110   :  { %v163_v30 = vmul.f32 %v161_v28, %v155_v29 }
 0x112   :  { %165 = vrot.lane.b32.xlu0 %v163_v30, %s908_s11 }
 0x184   :  { %v166_v32 = vpop.permute.xlu0 %165 }
 0x185   :  { %v168_v33 = vadd.f32 %v166_v32, %v158_v31 }
 0x187   :  { %767 = vtanh.f32 %v168_v33  ;;  %v228_v57 = vrot.slane %v168_v33, 4 }
 0x18d   :  { %v768_v34 = vpop.eup %767 }
 0x18e   :  { %171 = vrot.lane.b32.xlu1 %v768_v34, %s908_s11 }
 0x200   :  { %v172_v35 = vpop.permute.xlu1 %171 }
 0x201   :  { %v174_v36 = vmul.f32 %v172_v35, %v155_v29 }
 0x203   :  { %176 = vrot.lane.b32.xlu1 %v174_v36, %s909_s3 }
 0x275   :  { %v177_v37 = vpop.permute.xlu1 %176 }
 0x276   :  { %180 = vst.msk [vmem:[#allocation2 - $0x3] sm:$0x8] %vm179_vm5, %v177_v37  ;;  %736 = vmatmul.msk.f32.vlgmr.msra.gmra.mxu2 %vm68_vm0, %v177_v37 }
 0x277   :  { %622 = vmatpush.msra.mxu2 %v952_v2 }
 0x279   :  { %623 = vmatpush.msra.mxu2 %v955_v3  ;;  %v101_v3 = vpop.f32.mrf.mxu0 }
 0x27a   :  { %v102_v4 = vadd.f32 %v995_v10, %v101_v3 }
 0x27b   :  { %624 = vmatpush.msra.mxu2 %v957_v5 }
 0x27d   :  { %625 = vmatpush.msra.mxu2 %v962_v7 }
 0x2f9   :  { %v200_v38 = vpop.f32.mrf.mxu2 }
 0x2fa   :  { %v204_v39 = vrot.slane %v200_v38, 4 }
 0x2fc   :  { %v206_v40 = vadd.f32 %v204_v39, %v99_v13 }
 0x2fe   :  { %769 = vtanh.f32 %v206_v40  ;;  %v737_v42 = vmul.f32 -1.442695, %v206_v40 }
 0x300   :  { %771 = vpow2.f32 %v737_v42 }
 0x304   :  { %v770_v41 = vpop.eup %769 }
 0x305   :  { %232 = vrot.lane.b32.xlu2 %v770_v41, %s908_s11 }
 0x306   :  { %v772_v43 = vpop.eup %771 }
 0x307   :  { %v210_v44 = vadd.f32 1.0, %v772_v43 }
 0x309   :  { %773 = vrcp.f32 %v210_v44  ;;  %v222_v50 = vand.u32 2147483648, %v210_v44  ;;  %vm216_vm7 = vweird.f32 %v210_v44  ;;  %v220_v51 = vand.u32 2147483647, %v210_v44 }
 0x30b   :  { %v223_v53 = vor.u32 1.1754944e-38, %v222_v50  ;;  %vm221_vm9 = vcmp.eq.f32.partialorder %v220_v51, 8.507059e+37 }
 0x30f   :  { %v774_v45 = vpop.eup %773 }
 0x310   :  { %v212_v46 = vmul.f32 %v774_v45, %v210_v44  ;;  %vm217_vm6 = vweird.f32 %v774_v45 }
 0x311   :  { %vm218_vm8 = vmor %vm216_vm7, %vm217_vm6 }
 0x312   :  { %v213_v47 = vsub.f32 1.0, %v212_v46 }
 0x314   :  { %v214_v48 = vmul.f32 %v774_v45, %v213_v47 }
 0x316   :  { %v215_v49 = vadd.f32 %v774_v45, %v214_v48 }
 0x318   :  { %v219_v52 = vsel %vm218_vm8, %v774_v45, %v215_v49 }
 0x319   :  { %v224_v55 = vsel %vm221_vm9, %v223_v53, %v219_v52 }
 0x31a   :  { %v230_v58 = vmul.f32 %v228_v57, %v224_v55 }
 0x35f   :  { %v233_v54 = vpop.permute.xlu2 %232 }
 0x360   :  { %v235_v56 = vmul.f32 %v233_v54, %v224_v55 }
 0x362   :  { %237 = vrot.lane.b32.xlu2 %v235_v56, %s908_s11 }
 0x3bc   :  { %v238_v59 = vpop.permute.xlu2 %237 }
 0x3bd   :  { %v240_v60 = vadd.f32 %v238_v59, %v230_v58  ;;  %v58_v59 = vld [vmem:[%s1098_s0 + $0x10] sm:$0xff] }
 0x3be   :  { %733 = vmatmul.msk.f32.gmra.mxu0 %vm68_vm0, %v58_v59 }
 0x3bf   :  { %775 = vtanh.f32 %v240_v60  ;;  %v300_v24 = vrot.slane %v240_v60, 4 }
 0x3c5   :  { %v776_v61 = vpop.eup %775 }
 0x3c6   :  { %243 = vrot.lane.b32.xlu0 %v776_v61, %s908_s11 }
 0x438   :  { %v244_v62 = vpop.permute.xlu0 %243 }
 0x439   :  { %v1011_v63 = vmul.f32 %v244_v62, %v224_v55 }
 0x43b   :  { %v253_v0 = vrot.slane %v1011_v63, 4  ;;  %v104_v61 = vpop.f32.mrf.mxu0 }
 0x43c   :  { %v105_v62 = vadd.f32 %v995_v10, %v104_v61 }
 0x43d   :  { %254 = vrot.lane.b32.xlu1 %v253_v0, %s909_s3 }
 0x4af   :  { %v255_v2 = vpop.permute.xlu1 %254 }
 0x4b0   :  { %738 = vmatmul.msk.f32.vlgmr.msra.gmra.mxu3 %vm68_vm0, %v255_v2 }
 0x533   :  { %v275_v5 = vpop.f32.mrf.mxu3 }
 0x534   :  { %v278_v6 = vadd.f32 %v275_v5, %v102_v4 }
 0x536   :  { %777 = vtanh.f32 %v278_v6  ;;  %v739_v8 = vmul.f32 -1.442695, %v278_v6 }
 0x538   :  { %779 = vpow2.f32 %v739_v8 }
 0x53c   :  { %v778_v7 = vpop.eup %777 }
 0x53d   :  { %304 = vrot.lane.b32.xlu2 %v778_v7, %s908_s11 }
 0x53e   :  { %v780_v9 = vpop.eup %779 }
 0x53f   :  { %v282_v11 = vadd.f32 1.0, %v780_v9 }
 0x541   :  { %781 = vrcp.f32 %v282_v11  ;;  %v294_v17 = vand.u32 2147483648, %v282_v11  ;;  %vm288_vm11 = vweird.f32 %v282_v11  ;;  %v292_v18 = vand.u32 2147483647, %v282_v11 }
 0x543   :  { %v295_v20 = vor.u32 1.1754944e-38, %v294_v17  ;;  %vm293_vm13 = vcmp.eq.f32.partialorder %v292_v18, 8.507059e+37 }
 0x547   :  { %v782_v12 = vpop.eup %781 }
 0x548   :  { %v284_v13 = vmul.f32 %v782_v12, %v282_v11  ;;  %vm289_vm10 = vweird.f32 %v782_v12 }
 0x549   :  { %vm290_vm12 = vmor %vm288_vm11, %vm289_vm10 }
 0x54a   :  { %v285_v14 = vsub.f32 1.0, %v284_v13 }
 0x54c   :  { %v286_v15 = vmul.f32 %v782_v12, %v285_v14 }
 0x54e   :  { %v287_v16 = vadd.f32 %v782_v12, %v286_v15 }
 0x550   :  { %v291_v19 = vsel %vm290_vm12, %v782_v12, %v287_v16 }
 0x551   :  { %v296_v22 = vsel %vm293_vm13, %v295_v20, %v291_v19 }
 0x552   :  { %v302_v25 = vmul.f32 %v300_v24, %v296_v22 }
 0x597   :  { %v305_v21 = vpop.permute.xlu2 %304 }
 0x598   :  { %v307_v23 = vmul.f32 %v305_v21, %v296_v22 }
 0x59a   :  { %309 = vrot.lane.b32.xlu0 %v307_v23, %s908_s11 }
 0x60c   :  { %v310_v26 = vpop.permute.xlu0 %309 }
 0x60d   :  { %v312_v27 = vadd.f32 %v310_v26, %v302_v25 }
 0x60f   :  { %783 = vtanh.f32 %v312_v27  ;;  %v371_v51 = vrot.slane %v312_v27, 4 }
 0x615   :  { %v784_v28 = vpop.eup %783 }
 0x616   :  { %315 = vrot.lane.b32.xlu1 %v784_v28, %s908_s11 }
 0x688   :  { %v316_v29 = vpop.permute.xlu1 %315 }
 0x689   :  { %v318_v30 = vmul.f32 %v316_v29, %v296_v22 }
 0x68b   :  { %320 = vrot.lane.b32.xlu2 %v318_v30, %s909_s3 }
 0x6e5   :  { %v321_v31 = vpop.permute.xlu2 %320 }
 0x6e6   :  { %323 = vst.msk [vmem:[#allocation2 - $0x1] sm:$0x8] %vm179_vm5, %v321_v31  ;;  %740 = vmatmul.msk.f32.vlgmr.msrb.gmra.mxu1 %vm68_vm0, %v321_v31 }
 0x763   :  { %v343_v32 = vpop.f32.mrf.mxu1 }
 0x764   :  { %v347_v33 = vrot.slane %v343_v32, 4 }
 0x766   :  { %v349_v34 = vadd.f32 %v347_v33, %v102_v4 }
 0x768   :  { %785 = vtanh.f32 %v349_v34  ;;  %v741_v36 = vmul.f32 -1.442695, %v349_v34 }
 0x76a   :  { %787 = vpow2.f32 %v741_v36 }
 0x76e   :  { %v786_v35 = vpop.eup %785 }
 0x76f   :  { %375 = vrot.lane.b32.xlu0 %v786_v35, %s908_s11 }
 0x770   :  { %v788_v37 = vpop.eup %787 }
 0x771   :  { %v353_v38 = vadd.f32 1.0, %v788_v37 }
 0x773   :  { %789 = vrcp.f32 %v353_v38  ;;  %v365_v44 = vand.u32 2147483648, %v353_v38  ;;  %vm359_vm15 = vweird.f32 %v353_v38  ;;  %v363_v45 = vand.u32 2147483647, %v353_v38 }
 0x775   :  { %v366_v47 = vor.u32 1.1754944e-38, %v365_v44  ;;  %vm364_vm2 = vcmp.eq.f32.partialorder %v363_v45, 8.507059e+37 }
 0x779   :  { %v790_v39 = vpop.eup %789 }
 0x77a   :  { %v355_v40 = vmul.f32 %v790_v39, %v353_v38  ;;  %vm360_vm14 = vweird.f32 %v790_v39 }
 0x77b   :  { %vm361_vm1 = vmor %vm359_vm15, %vm360_vm14 }
 0x77c   :  { %v356_v41 = vsub.f32 1.0, %v355_v40 }
 0x77e   :  { %v357_v42 = vmul.f32 %v790_v39, %v356_v41 }
 0x780   :  { %v358_v43 = vadd.f32 %v790_v39, %v357_v42 }
 0x782   :  { %v362_v46 = vsel %vm361_vm1, %v790_v39, %v358_v43 }
 0x783   :  { %v367_v49 = vsel %vm364_vm2, %v366_v47, %v362_v46 }
 0x784   :  { %v373_v52 = vmul.f32 %v371_v51, %v367_v49  ;;  %v59_v51 = vld [vmem:[%s1098_s0 + $0x18] sm:$0xff] }
 0x785   :  { %734 = vmatmul.msk.f32.gmra.mxu0 %vm68_vm0, %v59_v51  ;;  %v681_v51 = vld [vmem:[%s1102_s4 + $0x8] sm:$0xff] }
 0x7e1   :  { %v376_v48 = vpop.permute.xlu0 %375 }
 0x7e2   :  { %v378_v50 = vmul.f32 %v376_v48, %v367_v49 }
 0x7e4   :  { %380 = vrot.lane.b32.xlu1 %v378_v50, %s908_s11 }
 0x856   :  { %v381_v53 = vpop.permute.xlu1 %380 }
 0x857   :  { %v383_v54 = vadd.f32 %v381_v53, %v373_v52 }
 0x859   :  { %791 = vtanh.f32 %v383_v54  ;;  %v442_v19 = vrot.slane %v383_v54, 4 }
 0x85f   :  { %v792_v55 = vpop.eup %791 }
 0x860   :  { %386 = vrot.lane.b32.xlu2 %v792_v55, %s908_s11 }
 0x8ba   :  { %v387_v56 = vpop.permute.xlu2 %386 }
 0x8bb   :  { %v1030_v57 = vmul.f32 %v387_v56, %v367_v49  ;;  %v107_v56 = vpop.f32.mrf.mxu0 }
 0x8bd   :  { %v395_v58 = vrot.slane %v1030_v57, 4 }
 0x8bf   :  { %396 = vrot.lane.b32.xlu0 %v395_v58, %s909_s3  ;;  %v108_v58 = vadd.f32 %v995_v10, %v107_v56 }
 0x931   :  { %v397_v60 = vpop.permute.xlu0 %396 }
 0x932   :  { %742 = vmatmul.msk.f32.vlgmr.msrb.gmra.mxu2 %vm68_vm0, %v397_v60 }
 0x9b5   :  { %v417_v0 = vpop.f32.mrf.mxu2 }
 0x9b6   :  { %v420_v1 = vadd.f32 %v417_v0, %v105_v62 }
 0x9b8   :  { %793 = vtanh.f32 %v420_v1  ;;  %v743_v3 = vmul.f32 -1.442695, %v420_v1 }
 0x9ba   :  { %795 = vpow2.f32 %v743_v3 }
 0x9be   :  { %v794_v2 = vpop.eup %793 }
 0x9bf   :  { %446 = vrot.lane.b32.xlu1 %v794_v2, %s908_s11 }
 0x9c0   :  { %v796_v4 = vpop.eup %795 }
 0x9c1   :  { %v424_v5 = vadd.f32 1.0, %v796_v4 }
 0x9c3   :  { %797 = vrcp.f32 %v424_v5  ;;  %v436_v12 = vand.u32 2147483648, %v424_v5  ;;  %vm430_vm4 = vweird.f32 %v424_v5  ;;  %v434_v13 = vand.u32 2147483647, %v424_v5 }
 0x9c5   :  { %v437_v15 = vor.u32 1.1754944e-38, %v436_v12  ;;  %vm435_vm7 = vcmp.eq.f32.partialorder %v434_v13, 8.507059e+37 }
 0x9c9   :  { %v798_v6 = vpop.eup %797 }
 0x9ca   :  { %v426_v7 = vmul.f32 %v798_v6, %v424_v5  ;;  %vm431_vm3 = vweird.f32 %v798_v6 }
 0x9cb   :  { %vm432_vm6 = vmor %vm430_vm4, %vm431_vm3  ;;  %vm251_vm4 = vcmask 261127  }
 0x9cc   :  { %v427_v8 = vsub.f32 1.0, %v426_v7 }
 0x9ce   :  { %v428_v9 = vmul.f32 %v798_v6, %v427_v8 }
 0x9d0   :  { %v429_v11 = vadd.f32 %v798_v6, %v428_v9 }
 0x9d2   :  { %v433_v14 = vsel %vm432_vm6, %v798_v6, %v429_v11  ;;  %vm711_vm6 = vcmask 64512  }
 0x9d3   :  { %v438_v17 = vsel %vm435_vm7, %v437_v15, %v433_v14 }
 0x9d4   :  { %v444_v20 = vmul.f32 %v442_v19, %v438_v17 }
 0xa31   :  { %v447_v16 = vpop.permute.xlu1 %446 }
 0xa32   :  { %v449_v18 = vmul.f32 %v447_v16, %v438_v17 }
 0xa34   :  { %451 = vrot.lane.b32.xlu2 %v449_v18, %s908_s11 }
 0xa8e   :  { %v452_v21 = vpop.permute.xlu2 %451 }
 0xa8f   :  { %v454_v22 = vadd.f32 %v452_v21, %v444_v20 }
 0xa91   :  { %799 = vtanh.f32 %v454_v22  ;;  %v513_v46 = vrot.slane %v454_v22, 4 }
 0xa97   :  { %v800_v23 = vpop.eup %799 }
 0xa98   :  { %457 = vrot.lane.b32.xlu0 %v800_v23, %s908_s11 }
 0xb0a   :  { %v458_v24 = vpop.permute.xlu0 %457 }
 0xb0b   :  { %v460_v25 = vmul.f32 %v458_v24, %v438_v17 }
 0xb0d   :  { %462 = vrot.lane.b32.xlu1 %v460_v25, %s909_s3 }
 0xb7f   :  { %v463_v26 = vpop.permute.xlu1 %462 }
 0xb80   :  { %465 = vst.msk [vmem:[#allocation2 + $0x1] sm:$0x8] %vm179_vm5, %v463_v26  ;;  %744 = vmatmul.msk.f32.vlgmr.msrb.gmra.mxu3 %vm68_vm0, %v463_v26 }
 0xc03   :  { %v485_v27 = vpop.f32.mrf.mxu3 }
 0xc04   :  { %v489_v28 = vrot.slane %v485_v27, 4 }
 0xc06   :  { %v491_v29 = vadd.f32 %v489_v28, %v105_v62 }
 0xc08   :  { %801 = vtanh.f32 %v491_v29  ;;  %v745_v31 = vmul.f32 -1.442695, %v491_v29 }
 0xc0a   :  { %803 = vpow2.f32 %v745_v31 }
 0xc0e   :  { %v802_v30 = vpop.eup %801 }
 0xc0f   :  { %517 = vrot.lane.b32.xlu2 %v802_v30, %s908_s11 }
 0xc10   :  { %v804_v32 = vpop.eup %803 }
 0xc11   :  { %v495_v33 = vadd.f32 1.0, %v804_v32 }
 0xc13   :  { %805 = vrcp.f32 %v495_v33  ;;  %v507_v39 = vand.u32 2147483648, %v495_v33  ;;  %vm501_vm9 = vweird.f32 %v495_v33  ;;  %v505_v40 = vand.u32 2147483647, %v495_v33 }
 0xc15   :  { %v508_v42 = vor.u32 1.1754944e-38, %v507_v39  ;;  %vm506_vm11 = vcmp.eq.f32.partialorder %v505_v40, 8.507059e+37 }
 0xc19   :  { %v806_v34 = vpop.eup %805 }
 0xc1a   :  { %v497_v35 = vmul.f32 %v806_v34, %v495_v33  ;;  %vm502_vm8 = vweird.f32 %v806_v34 }
 0xc1b   :  { %vm503_vm10 = vmor %vm501_vm9, %vm502_vm8 }
 0xc1c   :  { %v498_v36 = vsub.f32 1.0, %v497_v35 }
 0xc1e   :  { %v499_v37 = vmul.f32 %v806_v34, %v498_v36 }
 0xc20   :  { %v500_v38 = vadd.f32 %v806_v34, %v499_v37 }
 0xc22   :  { %v504_v41 = vsel %vm503_vm10, %v806_v34, %v500_v38 }
 0xc23   :  { %v509_v44 = vsel %vm506_vm11, %v508_v42, %v504_v41 }
 0xc24   :  { %v515_v47 = vmul.f32 %v513_v46, %v509_v44 }
 0xc69   :  { %v518_v43 = vpop.permute.xlu2 %517 }
 0xc6a   :  { %v520_v45 = vmul.f32 %v518_v43, %v509_v44 }
 0xc6c   :  { %522 = vrot.lane.b32.xlu0 %v520_v45, %s908_s11 }
 0xcde   :  { %v523_v48 = vpop.permute.xlu0 %522 }
 0xcdf   :  { %v525_v49 = vadd.f32 %v523_v48, %v515_v47 }
 0xce1   :  { %807 = vtanh.f32 %v525_v49  ;;  %v584_v14 = vrot.slane %v525_v49, 4 }
 0xce7   :  { %v808_v50 = vpop.eup %807 }
 0xce8   :  { %528 = vrot.lane.b32.xlu1 %v808_v50, %s908_s11  ;;  %v682_v50 = vld [vmem:[%s1102_s4 + $0x10] sm:$0xff] }
 0xd5a   :  { %v529_v52 = vpop.permute.xlu1 %528 }
 0xd5b   :  { %v1053_v53 = vmul.f32 %v529_v52, %v509_v44  ;;  %v680_v52 = vld [vmem:[%s1102_s4] sm:$0xff] }
 0xd5d   :  { %v537_v54 = vrot.slane %v1053_v53, 4 }
 0xd5f   :  { %538 = vrot.lane.b32.xlu2 %v537_v54, %s909_s3 }
 0xdb9   :  { %v539_v55 = vpop.permute.xlu2 %538 }
 0xdba   :  { %746 = vmatmul.msk.f32.vlgmr.msra.gmra.mxu1 %vm68_vm0, %v539_v55  ;;  %v760_v55 = vld [vmem:[%s1103_s5] ss:$0 sm:$0xff] }
 0xe37   :  { %v559_v59 = vpop.f32.mrf.mxu1 }
 0xe38   :  { %v562_v60 = vadd.f32 %v559_v59, %v108_v58 }
 0xe3a   :  { %809 = vtanh.f32 %v562_v60  ;;  %v747_v62 = vmul.f32 -1.442695, %v562_v60 }
 0xe3c   :  { %811 = vpow2.f32 %v747_v62 }
 0xe40   :  { %v810_v61 = vpop.eup %809 }
 0xe41   :  { %588 = vrot.lane.b32.xlu0 %v810_v61, %s908_s11 }
 0xe42   :  { %v812_v0 = vpop.eup %811 }
 0xe43   :  { %v566_v1 = vadd.f32 1.0, %v812_v0 }
 0xe45   :  { %813 = vrcp.f32 %v566_v1  ;;  %v578_v7 = vand.u32 2147483648, %v566_v1  ;;  %vm572_vm13 = vweird.f32 %v566_v1  ;;  %v576_v10 = vand.u32 2147483647, %v566_v1 }
 0xe47   :  { %v579_v9 = vor.u32 1.1754944e-38, %v578_v7  ;;  %vm577_vm15 = vcmp.eq.f32.partialorder %v576_v10, 8.507059e+37 }
 0xe4b   :  { %v814_v2 = vpop.eup %813 }
 0xe4c   :  { %v568_v3 = vmul.f32 %v814_v2, %v566_v1  ;;  %vm573_vm12 = vweird.f32 %v814_v2 }
 0xe4d   :  { %vm574_vm14 = vmor %vm572_vm13, %vm573_vm12 }
 0xe4e   :  { %v569_v4 = vsub.f32 1.0, %v568_v3 }
 0xe50   :  { %v570_v5 = vmul.f32 %v814_v2, %v569_v4 }
 0xe52   :  { %v571_v6 = vadd.f32 %v814_v2, %v570_v5 }
 0xe54   :  { %v575_v8 = vsel %vm574_vm14, %v814_v2, %v571_v6 }
 0xe55   :  { %v580_v12 = vsel %vm577_vm15, %v579_v9, %v575_v8 }
 0xe56   :  { %v586_v15 = vmul.f32 %v584_v14, %v580_v12 }
 0xeb3   :  { %v589_v11 = vpop.permute.xlu0 %588 }
 0xeb4   :  { %v591_v13 = vmul.f32 %v589_v11, %v580_v12 }
 0xeb6   :  { %593 = vrot.lane.b32.xlu1 %v591_v13, %s908_s11 }
 0xf28   :  { %v594_v16 = vpop.permute.xlu1 %593 }
 0xf29   :  { %v596_v17 = vadd.f32 %v594_v16, %v586_v15 }
 0xf2b   :  { %815 = vtanh.f32 %v596_v17  ;;  %v655_v41 = vrot.slane %v596_v17, 4 }
 0xf31   :  { %v816_v18 = vpop.eup %815 }
 0xf32   :  { %599 = vrot.lane.b32.xlu2 %v816_v18, %s908_s11 }
 0xf8c   :  { %v600_v19 = vpop.permute.xlu2 %599 }
 0xf8d   :  { %v602_v20 = vmul.f32 %v600_v19, %v580_v12 }
 0xf8f   :  { %604 = vrot.lane.b32.xlu0 %v602_v20, %s909_s3 }
0x1001   :  { %v605_v21 = vpop.permute.xlu0 %604 }
0x1002   :  { %607 = vst.msk [vmem:[#allocation2 + $0x3] sm:$0x8] %vm179_vm5, %v605_v21  ;;  %748 = vmatmul.msk.f32.vlgmr.msra.gmra.mxu2 %vm68_vm0, %v605_v21 }
0x1085   :  { %v627_v22 = vpop.f32.mrf.mxu2 }
0x1086   :  { %v631_v23 = vrot.slane %v627_v22, 4 }
0x1088   :  { %v633_v24 = vadd.f32 %v631_v23, %v108_v58 }
0x108a   :  { %817 = vtanh.f32 %v633_v24  ;;  %v749_v26 = vmul.f32 -1.442695, %v633_v24 }
0x108c   :  { %819 = vpow2.f32 %v749_v26 }
0x1090   :  { %v818_v25 = vpop.eup %817 }
0x1091   :  { %659 = vrot.lane.b32.xlu1 %v818_v25, %s908_s11 }
0x1092   :  { %v820_v27 = vpop.eup %819 }
0x1093   :  { %v637_v28 = vadd.f32 1.0, %v820_v27 }
0x1095   :  { %821 = vrcp.f32 %v637_v28  ;;  %v649_v34 = vand.u32 2147483648, %v637_v28  ;;  %vm643_vm1 = vweird.f32 %v637_v28  ;;  %v647_v35 = vand.u32 2147483647, %v637_v28 }
0x1097   :  { %v650_v37 = vor.u32 1.1754944e-38, %v649_v34  ;;  %vm648_vm3 = vcmp.eq.f32.partialorder %v647_v35, 8.507059e+37 }
0x1099   :  { %248 = vrot.lane.b32.xlu1 %v1011_v63, %s909_s3 }
0x109b   :  { %v822_v29 = vpop.eup %821 }
0x109c   :  { %v639_v30 = vmul.f32 %v822_v29, %v637_v28  ;;  %vm644_vm5 = vweird.f32 %v822_v29 }
0x109d   :  { %vm645_vm2 = vmor %vm643_vm1, %vm644_vm5 }
0x109e   :  { %v640_v31 = vsub.f32 1.0, %v639_v30 }
0x10a0   :  { %v641_v32 = vmul.f32 %v822_v29, %v640_v31 }
0x10a2   :  { %v642_v33 = vadd.f32 %v822_v29, %v641_v32 }
0x10a4   :  { %v646_v36 = vsel %vm645_vm2, %v822_v29, %v642_v33 }
0x10a5   :  { %v651_v63 = vsel %vm648_vm3, %v650_v37, %v646_v36 }
0x10a6   :  { %v657_v42 = vmul.f32 %v655_v41, %v651_v63 }
0x1103   :  { %v660_v38 = vpop.permute.xlu1 %659 }
0x1104   :  { %v662_v39 = vmul.f32 %v660_v38, %v651_v63 }
0x1106   :  { %664 = vrot.lane.b32.xlu2 %v662_v39, %s908_s11 }
0x110b   :  { %v249_v40 = vpop.permute.xlu1 %248 }
0x110c   :  { %252 = vst.msk [vmem:[#allocation2 - $0x6] sm:$0x80] %vm251_vm4, %v249_v40 }
0x110e   :  { %391 = vrot.lane.b32.xlu2 %v1030_v57, %s909_s3  ;;  %v683_v57 = vld [vmem:[%s1102_s4 + $0x18] sm:$0xff] }
0x110f   :  { %703 = vmatpush.msra.mxu3 %v683_v57 }
0x1111   :  { %704 = vmatpush.msra.mxu3 %v682_v50 }
0x1113   :  { %705 = vmatpush.msra.mxu3 %v681_v51 }
0x1115   :  { %706 = vmatpush.msra.mxu3 %v680_v52 }
0x1160   :  { %v665_v43 = vpop.permute.xlu2 %664 }
0x1161   :  { %v667_v44 = vadd.f32 %v665_v43, %v657_v42 }
0x1163   :  { %823 = vtanh.f32 %v667_v44 }
0x1168   :  { %v392_v45 = vpop.permute.xlu2 %391 }
0x1169   :  { %v824_v46 = vpop.eup %823  ;;  %394 = vst.msk [vmem:[#allocation2 - $0x4] sm:$0x80] %vm251_vm4, %v392_v45 }
0x116a   :  { %670 = vrot.lane.b32.xlu0 %v824_v46, %s908_s11 }
0x1172   :  { %533 = vrot.lane.b32.xlu0 %v1053_v53, %s909_s3 }
0x11dc   :  { %v671_v47 = vpop.permute.xlu0 %670 }
0x11dd   :  { %v673_v48 = vmul.f32 %v671_v47, %v651_v63 }
0x11df   :  { %675 = vrot.lane.b32.xlu1 %v673_v48, %s909_s3 }
0x11e4   :  { %v534_v49 = vpop.permute.xlu0 %533 }
0x11e5   :  { %536 = vst.msk [vmem:[#allocation2 - $0x2] sm:$0x80] %vm251_vm4, %v534_v49 }
0x1251   :  { %v676_v53 = vpop.permute.xlu1 %675 }
0x1252   :  { %678 = vst.msk [vmem:[#allocation2] sm:$0x80] %vm251_vm4, %v676_v53 }
0x1259   :  { %v679_v54 = vld [vmem:[#allocation2] sm:$0xff] }
0x125a   :  { %750 = vmatmul.msk.f32.vlgmr.msra.gmra.mxu3 %vm68_vm0, %v679_v54 }
0x12dd   :  { %v708_v56 = vpop.f32.mrf.mxu3 }
0x12de   :  { %v709_v58 = vadd.f32 %v760_v55, %v708_v56 }
0x12e0   :  { %712 = vst.msk [vmem:[#allocation8] sm:$0xff] %vm711_vm6, %v709_v58 }
0x12e1   :  { %723 = dma.vmem_to_hbm [thread:$0]  %s719_s28, 128, %s721_s7, [#allocation5]  }
0x12e2   :  { %901 = dma.done.wait [#allocation5], 128  }
0x12e3   :  { %902 = vsyncadd [#allocation5], 4294967168 }
0x12e4   :  { %728 = vsyncpa [#allocation4], 1 }
0x12e5   :  { %729 = vsyncpa [#allocation7], 1 }
0x12e6   :  { %730 = vsyncpa [#allocation5], 1 }

</bundles_post_ra>
